<compile_context>
chip_gen: v7x
topology: tpu7x:2x2x1
jax: 0.10.0
libtpu: 0.0.40
codegen_flags: <defaults>
</compile_context>

<pallas_src>
import functools

import jax
import jax.numpy as jnp
from jax import lax
from jax.experimental import pallas as pl
from jax.experimental.pallas import tpu as pltpu


def _round_up(x, m):
    return -(-x // m) * m


def _roll_probe_kernel(x_ref, o_ref):
    o_ref[...] = pltpu.roll(x_ref[...], 1, axis=1)


@functools.lru_cache(maxsize=None)
def _roll_is_numpy_convention():
    """True iff pltpu.roll(x, +1) moves elements toward higher indices (np.roll)."""
    x = jnp.broadcast_to(jnp.arange(128, dtype=jnp.int32), (8, 128))
    y = pl.pallas_call(
        _roll_probe_kernel,
        out_shape=jax.ShapeDtypeStruct((8, 128), jnp.int32),
    )(x)
    return bool(y[0, 0] == 127)


def _tv_kernel(x_ref, o_ref, acc_ref, bacc_ref, prev_ref, *,
               img_w, nstrip, numpy_roll):
    b = pl.program_id(0)            # image-block index
    s = pl.program_id(1)            # row-strip index
    nb, sw = x_ref.shape

    @pl.when((b == 0) & (s == 0))
    def _init():
        acc_ref[...] = jnp.zeros_like(acc_ref)
        bacc_ref[...] = jnp.zeros_like(bacc_ref)

    x = x_ref[...].astype(jnp.float32)               # DMA stays in input dtype
    col = lax.broadcasted_iota(jnp.int32, (1, sw), 1)

    # Backward neighbour diffs via lane rolls (XLU) + masks.
    sh1 = 1 if numpy_roll else (sw - 1) % sw         # value of x[j-1] at lane j
    tv = jnp.where(col % img_w != 0,
                   jnp.abs(x - pltpu.roll(x, sh1, axis=1)), 0.0)
    if sw > img_w:                                   # in-strip vertical diffs
        shw = img_w if numpy_roll else sw - img_w    # value of x[j-W] at lane j
        tv = tv + jnp.where(col >= img_w,
                            jnp.abs(x - pltpu.roll(x, shw, axis=1)), 0.0)

    # Fold the image axis with tile-aligned 8-row adds (pure VPU, no cross-lane
    # reduce in the hot loop), then accumulate into the single (8, sw) scratch.
    part = tv[0:8, :]
    for g in range(1, nb // 8):
        part = part + tv[g * 8:(g + 1) * 8, :]
    acc_ref[...] += part

    if nstrip > 1:
        # Vertical diff across the strip boundary: first row of this strip vs
        # the previous strip's last row (carried in prev_ref).
        @pl.when(s > 0)
        def _strip_boundary():
            d = jnp.abs(x[:, 0:img_w] - prev_ref[...])
            bp = d[0:8, :]
            for g in range(1, nb // 8):
                bp = bp + d[g * 8:(g + 1) * 8, :]
            bacc_ref[...] += bp

        prev_ref[...] = x[:, sw - img_w:sw]

    @pl.when((b == pl.num_programs(0) - 1) & (s == pl.num_programs(1) - 1))
    def _finalize():
        total = jnp.sum(acc_ref[...]) + jnp.sum(bacc_ref[...])
        o_ref[...] = jnp.broadcast_to(total, o_ref.shape)


def _choose_tiling(n_images, h, w, itemsize):
    """Pick (NB images/block, CH rows/strip, vmem_limit) from a VMEM model."""
    try:
        vmem_cap = int(pltpu.get_tpu_info().vmem_capacity_bytes)
    except Exception:
        vmem_cap = 64 * 1024 * 1024                  # v7x physical VMEM (smallest)
    vmem_limit = max(32 * 1024 * 1024,
                     min((vmem_cap * 3) // 4, 100 * 1024 * 1024))
    budget = vmem_limit - 6 * 1024 * 1024            # headroom for Mosaic scratch

    wp = _round_up(w, 128)

    def cost(ch, nb):
        swp = _round_up(ch * w, 128)                 # lane-padded strip width
        # double-buffered input block + f32 cast / rolled copies / diff temps
        # + accumulators + boundary-carry scratch
        return (nb * swp * (2 * itemsize + 16)
                + 8 * swp * 4 + 8 * wp * 4 + nb * wp * 4)

    if cost(h, 8) <= budget:
        ch = h                                       # whole image per block
    else:
        divisors = [d for d in range(1, h) if h % d == 0 and cost(d, 8) <= budget]
        aligned = [d for d in divisors if (d * w) % 128 == 0]
        if aligned:
            ch = max(aligned)
        elif divisors:
            # TODO(synk): strip width not a multiple of 128 lanes here; consider
            # transposing H<->W in the wrapper for such shapes.
            ch = max(divisors)
        else:
            ch = 1
    swp = _round_up(ch * w, 128)
    per_img = swp * (2 * itemsize + 16) + wp * 4
    nb_max = max(8, (budget - 8 * swp * 4 - 8 * wp * 4) // per_img)
    nb = max(8, (nb_max // 8) * 8)
    nb = min(nb, _round_up(n_images, 8))
    return int(nb), int(ch), int(vmem_limit)


def total_variation_loss(img, *, rows_per_strip=None):
    """img: (B, C, H, W). Returns the scalar TV loss of the PyTorch module."""
    B, C, H, W = img.shape
    N, L = B * C, H * W
    itemsize = jnp.dtype(img.dtype).itemsize

    NB, CH, vmem_limit = _choose_tiling(N, H, W, itemsize)
    if rows_per_strip is not None:                   # manual override / test hook
        assert H % rows_per_strip == 0
        CH = rows_per_strip
    SW = CH * W                                      # strip width (lanes)
    NSTRIP = H // CH
    NBLK = -(-N // NB)
    N_pad = NBLK * NB

    x2 = img.reshape(N, L)                           # metadata-only reshape
    if N_pad > N:                                    # zero images add 0 to the sum
        x2 = jnp.pad(x2, ((0, N_pad - N), (0, 0)))

    kernel = functools.partial(
        _tv_kernel, img_w=W, nstrip=NSTRIP,
        numpy_roll=_roll_is_numpy_convention())

    out = pl.pallas_call(
        kernel,
        out_shape=jax.ShapeDtypeStruct((8, 128), jnp.float32),
        grid=(NBLK, NSTRIP),
        in_specs=[pl.BlockSpec((NB, SW), lambda b, s: (b, s))],
        out_specs=pl.BlockSpec((8, 128), lambda b, s: (0, 0)),
        scratch_shapes=[
            pltpu.VMEM((8, SW), jnp.float32),        # fused TV accumulator
            pltpu.VMEM((8, W), jnp.float32),         # strip-boundary accumulator
            pltpu.VMEM((NB, W), jnp.float32),        # previous strip's last row
        ],
        compiler_params=pltpu.CompilerParams(
            # Both axes feed one resident accumulator -> keep them sequential.
            dimension_semantics=("arbitrary", "arbitrary"),
            vmem_limit_bytes=vmem_limit,
        ),
    )(x2)

    return out[0, 0] / jnp.float32(B * C * H * W)


def _reference_tv_loss(img):
    """Pure-JAX reference mirroring the PyTorch TotalVariationLoss module."""
    B, C, H, W = img.shape
    x = img.astype(jnp.float32)
    tv_h = jnp.sum(jnp.abs(x[:, :, 1:, :] - x[:, :, :-1, :]))
    tv_w = jnp.sum(jnp.abs(x[:, :, :, 1:] - x[:, :, :, :-1]))
    return (tv_h + tv_w) / (B * C * H * W)


if __name__ == "__main__":
    k0, k1, k2 = jax.random.split(jax.random.PRNGKey(0), 3)

    # Primary shape implied by the module (batch=2, channels=4, 16x16 images).
    img = jax.random.normal(k0, (2, 4, 16, 16), dtype=jnp.float32)
    loss = jax.block_until_ready(total_variation_loss(img))
    ref = jax.block_until_ready(_reference_tv_loss(img))
    assert jnp.allclose(loss, ref, rtol=1e-5, atol=1e-5), (loss, ref)

    # N = B*C not a multiple of 8: exercises zero-padding + multi-group fold.
    img2 = jax.random.normal(k1, (3, 5, 16, 16), dtype=jnp.float32)
    loss2 = jax.block_until_ready(total_variation_loss(img2))
    ref2 = jax.block_until_ready(_reference_tv_loss(img2))
    assert jnp.allclose(loss2, ref2, rtol=1e-5, atol=1e-5), (loss2, ref2)

    # Forced row-strip tiling: exercises the strip-boundary carry path that
    # bounds VMEM for large images.
    img3 = jax.random.normal(k2, (2, 4, 16, 32), dtype=jnp.float32)
    loss3 = jax.block_until_ready(total_variation_loss(img3, rows_per_strip=4))
    ref3 = jax.block_until_ready(_reference_tv_loss(img3))
    assert jnp.allclose(loss3, ref3, rtol=1e-5, atol=1e-5), (loss3, ref3)

    print("KERNEL_OK")
</pallas_src>

<mosaic_0001>
module attributes {stable_mosaic.version = 11 : i64} {
  func.func @_roll_probe_kernel(%arg0: memref<8x128xi32, #tpu.memory_space<vmem>>, %arg1: memref<8x128xi32, #tpu.memory_space<vmem>>) attributes {dimension_semantics = [], scalar_prefetch = 0 : i64, scratch_operands = 0 : i64, tpu.core_type = #tpu.core_type<tc>} {
    %c0 = arith.constant 0 : index
    %c0_0 = arith.constant 0 : index
    %0 = vector.load %arg0[%c0, %c0_0] : memref<8x128xi32, #tpu.memory_space<vmem>>, vector<8x128xi32>
    %c1_i32 = arith.constant 1 : i32
    %1 = tpu.dynamic_rotate %0 by %c1_i32 dim 1 : vector<8x128xi32>, i32 -> vector<8x128xi32>
    %c0_1 = arith.constant 0 : index
    %c0_2 = arith.constant 0 : index
    %2 = vector.load %arg1[%c0_1, %c0_2] : memref<8x128xi32, #tpu.memory_space<vmem>>, vector<8x128xi32>
    tpu.vector_store %arg1[%c0_1, %c0_2], %1 {strides = array<i32>} : memref<8x128xi32, #tpu.memory_space<vmem>>, vector<8x128xi32>,
    return
  }
}

</mosaic_0001>

<bundles_post_ra>
// kernel: tpu_custom_call.1
= control target key start
LH: loop header
LB: loop body
LE: loop exit
PB: predicated region body
PF: predicated region fallthrough
CT: control target
= control target key end

     0   :  { %6 = vsyncpa [#allocation3], 0  ;;  %s128_s0 = inlined_call_operand.hbm [shape: s32[8,128], index: 0, kind: input, shape index: {}]   ;;  %s129_s1 = inlined_call_operand.hbm [shape: s32[8,128], index: 1, kind: output, shape index: {}]  }
   0x1   :  { %7 = vsyncpa [#allocation4], 0  ;;  %s91_s6 = smov [#allocation2]   ;;  %s43_s10 = scalar_lea.hbm %s128_s0, 128 }
   0x2   :  { %s14_s7 = sshll.u32 %s91_s6, 4  ;;  %p44_p0 = scmp.ne.s32.totalorder %s128_s0, %s43_s10  ;;  %s15_s7 = int_to_ptr.vmem [resolvable:$true] %s14_s7 }
   0x3   :  { %p47_p1 = scmp.lt.u32.totalorder %s43_s10, %s128_s0 }
   0x5   :  { %p49_p2 = pnand %p47_p1, %p44_p0 }
   0x7   :  { %52 = shalt.err (!%p49_p2)
}
   0x8   :  { %s53_s15 = scalar_lea.vmem %s15_s7, 128  ;;  %p58_p4 = scmp.lt.s32.totalorder %s15_s7, %s15_s7 }
   0x9   :  { %p54_p3 = scmp.ne.s32.totalorder %s15_s7, %s53_s15  ;;  %p59_p5 = scmp.lt.s32.totalorder %s53_s15, %s53_s15 }
   0xb   :  { %p60_p6 = por %p59_p5, %p58_p4 }
   0xd   :  { %p61_p7 = pnand %p60_p6, %p54_p3 }
   0xf   :  { %64 = shalt.err (!%p61_p7)
}
  0x10   :  { %17 = dma.hbm_to_vmem [thread:$0]  %s128_s0, 128, %s15_s7, [#allocation3]  }
  0x11   :  { %87 = dma.done.wait [#allocation3], 128  }
  0x12   :  { %88 = vsyncadd [#allocation3], 4294967168  ;;  %v21_v0 = vld [vmem:[#allocation2] sm:$0xff]  ;;  %s92_s18 = smov 1   ;;  %s93_s19 = smov [#allocation5]  }
  0x13   :  { %22 = vrot.lane.b32.xlu0 %v21_v0, %s92_s18  ;;  %s31_s20 = sshll.u32 %s93_s19, 4  ;;  %s32_s20 = int_to_ptr.vmem [resolvable:$true] %s31_s20 }
  0x14   :  { %s65_s21 = scalar_lea.vmem %s32_s20, 128  ;;  %p70_p9 = scmp.lt.s32.totalorder %s32_s20, %s32_s20 }
  0x15   :  { %p66_p8 = scmp.ne.s32.totalorder %s32_s20, %s65_s21  ;;  %p71_p10 = scmp.lt.s32.totalorder %s65_s21, %s65_s21 }
  0x17   :  { %p72_p11 = por %p71_p10, %p70_p9 }
  0x19   :  { %p73_p12 = pnand %p72_p11, %p66_p8 }
  0x85   :  { %v23_v1 = vpop.permute.xlu0 %22 }
  0x86   :  { %24 = vst [vmem:[#allocation5] sm:$0xff] %v23_v1 }
  0x87   :  { %76 = shalt.err (!%p73_p12)
}
  0x88   :  { %s77_s0 = scalar_lea.hbm %s129_s1, 128 }
  0x89   :  { %p78_p13 = scmp.ne.s32.totalorder %s129_s1, %s77_s0  ;;  %p81_p0 = scmp.lt.u32.totalorder %s77_s0, %s129_s1 }
  0x8b   :  { %p83_p1 = pnand %p81_p0, %p78_p13 }
  0x8d   :  { %86 = shalt.err (!%p83_p1)
}
  0x8e   :  { %34 = dma.vmem_to_hbm [thread:$0]  %s32_s20, 128, %s129_s1, [#allocation4]  }
  0x8f   :  { %89 = dma.done.wait [#allocation4], 128  }
  0x90   :  { %90 = vsyncadd [#allocation4], 4294967168 }
  0x91   :  { %38 = vsyncpa [#allocation3], 1 }
  0x92   :  { %39 = vsyncpa [#allocation4], 1 }

</bundles_post_ra>
